<compile_context>
chip_gen: v5e
topology: v5e:2x2
jax: 0.10.0
libtpu: 0.0.40
codegen_flags: <defaults>
</compile_context>

<pallas_src>
import numpy as np
import jax
import jax.numpy as jnp
from jax.experimental import pallas as pl
from jax.experimental.pallas import tpu as pltpu

LANE = 128  # lane-dense last dim -> unmasked, full-lane vector stores


def _device_kind() -> str:
    try:
        return jax.devices()[0].device_kind.lower()
    except Exception:
        return ""


def _block_bytes() -> int:
    # v7x (~3.2 TB/s per TC) wants bigger blocks to amortize the fixed per-step
    # overhead; 4 MiB is a good default for v6e/v5e (v5e is fine because we raise
    # vmem_limit_bytes explicitly).
    kind = _device_kind()
    if "v7" in kind:
        return 8 << 20
    return 4 << 20


def _compute_dtype(dtype):
    # bf16 VPU/EUP exist on v6e/v7x; older chips (v5e and before) need f32 math.
    if dtype == jnp.bfloat16:
        kind = _device_kind()
        if ("v6" in kind) or ("v7" in kind) or ("trillium" in kind):
            return jnp.bfloat16
    return jnp.float32


def _make_glu_kernel(compute_dtype):
    def glu_kernel(x_ref, o_ref):
        # Elementwise x * sigmoid(x): exp on the EUP, mul/add on the VPU; the kernel
        # is HBM-bandwidth bound so compute is fully hidden under the DMAs.
        x = x_ref[...].astype(compute_dtype)
        sig = 1.0 / (1.0 + jnp.exp(-x))
        o_ref[...] = (x * sig).astype(o_ref.dtype)

    return glu_kernel


def glu_forward(x, *, small_fallback_elems: int = 0):
    """Pallas GLU: y = x * sigmoid(x). Any shape/dtype; returns same shape/dtype."""
    orig_shape = x.shape
    dtype = x.dtype
    n = int(np.prod(orig_shape)) if orig_shape else 1
    if n == 0:
        return x
    if n <= small_fallback_elems:
        # Optional: route tiny activations around the pallas_call fixed cost.
        return x * jax.nn.sigmoid(x)

    itemsize = jnp.dtype(dtype).itemsize
    sub = max(8, 32 // max(1, itemsize))  # packed sublane multiple: 8 f32 / 16 bf16 / 32 i8

    # Lane-dense (rows, 128) view.  Common path (numel % 128 == 0): free reshape, no
    # padding, no output slice.  Otherwise pad only the sub-128 tail.
    rows = pl.cdiv(n, LANE)
    padded = rows * LANE != n
    if padded:
        flat = jnp.pad(x.reshape(-1), (0, rows * LANE - n))
        x2 = flat.reshape(rows, LANE)
    else:
        x2 = x.reshape(rows, LANE)

    # Block-size selection: as large as the VMEM budget allows, but keep >= 4 grid
    # steps when there is enough work (>= 2 blocks per TensorCore on v7x megacore).
    max_block_rows = max(sub, _block_bytes() // (LANE * itemsize))
    block_rows = min(rows, max_block_rows)
    if rows >= 4 * sub:
        block_rows = min(block_rows, pl.cdiv(rows, 4))
    block_rows = max(sub, ((block_rows + sub - 1) // sub) * sub)
    grid = pl.cdiv(rows, block_rows)  # ragged last block is masked by Pallas

    out2 = pl.pallas_call(
        _make_glu_kernel(_compute_dtype(dtype)),
        out_shape=jax.ShapeDtypeStruct((rows, LANE), dtype),
        grid_spec=pltpu.PrefetchScalarGridSpec(
            num_scalar_prefetch=0,
            grid=(grid,),
            in_specs=[pl.BlockSpec((block_rows, LANE), lambda i: (i, 0))],
            out_specs=pl.BlockSpec((block_rows, LANE), lambda i: (i, 0)),
        ),
        compiler_params=pltpu.CompilerParams(
            dimension_semantics=("parallel",),
            vmem_limit_bytes=48 << 20,
        ),
    )(x2)

    if padded:
        return out2.reshape(-1)[:n].reshape(orig_shape)
    return out2.reshape(orig_shape)


def reference_forward(x):
    """Pure-JAX replica of the PyTorch forward: x * torch.sigmoid(x)."""
    return x * jax.nn.sigmoid(x)


def _check(x):
    out = jax.block_until_ready(glu_forward(x))
    ref = reference_forward(x)
    assert out.shape == x.shape and out.dtype == x.dtype
    np.testing.assert_allclose(
        np.asarray(out, dtype=np.float32),
        np.asarray(ref, dtype=np.float32),
        rtol=1e-5, atol=1e-6,
    )


if __name__ == "__main__":
    key = jax.random.PRNGKey(0)
    k0, k1, k2 = jax.random.split(key, 3)

    # Spec shape (small): single block, no padding (2*4*16*16 = 2048 = 16*128).
    _check(jax.random.normal(k0, (2, 4, 16, 16), jnp.float32))
    # Multi-step grid (grid=4), no padding.
    _check(jax.random.normal(k1, (64, 2048), jnp.float32))
    # Non-multiple-of-128 numel: exercises the tail-pad path.
    _check(jax.random.normal(k2, (3, 5, 67), jnp.float32))

    print("KERNEL_OK")
</pallas_src>

<mosaic_0001>
module attributes {stable_mosaic.version = 11 : i64} {
  func.func @glu_kernel(%arg0: i32, %arg1: memref<16x128xf32, #tpu.memory_space<vmem>>, %arg2: memref<16x128xf32, #tpu.memory_space<vmem>>) attributes {dimension_semantics = [#tpu.dimension_semantics<parallel>], iteration_bounds = array<i64: 1>, scalar_prefetch = 0 : i64, scratch_operands = 0 : i64, tpu.core_type = #tpu.core_type<tc>, window_params = [{transform_indices = @transform_0, window_bounds = array<i64: 16, 128>}, {transform_indices = @transform_1, window_bounds = array<i64: 16, 128>}]} {
    %c0 = arith.constant 0 : index
    %c0_0 = arith.constant 0 : index
    %0 = vector.load %arg1[%c0, %c0_0] : memref<16x128xf32, #tpu.memory_space<vmem>>, vector<16x128xf32>
    %cst = arith.constant 0.000000e+00 : f32
    %1 = vector.broadcast %cst : f32 to vector<16x128xf32>
    %2 = arith.subf %1, %0 : vector<16x128xf32>
    %3 = math.exp %2 : vector<16x128xf32>
    %cst_1 = arith.constant 1.000000e+00 : f32
    %4 = vector.broadcast %cst_1 : f32 to vector<16x128xf32>
    %5 = arith.addf %4, %3 : vector<16x128xf32>
    %cst_2 = arith.constant 1.000000e+00 : f32
    %6 = vector.broadcast %cst_2 : f32 to vector<16x128xf32>
    %7 = arith.divf %6, %5 : vector<16x128xf32>
    %8 = arith.mulf %0, %7 : vector<16x128xf32>
    %c0_3 = arith.constant 0 : index
    %c0_4 = arith.constant 0 : index
    %9 = vector.load %arg2[%c0_3, %c0_4] : memref<16x128xf32, #tpu.memory_space<vmem>>, vector<16x128xf32>
    tpu.vector_store %arg2[%c0_3, %c0_4], %8 {strides = array<i32>} : memref<16x128xf32, #tpu.memory_space<vmem>>, vector<16x128xf32>,
    return
  }
  func.func @transform_0(%arg0: i32) -> (i32, i32) {
    %c0_i32 = arith.constant 0 : i32
    %c0_i32_0 = arith.constant 0 : i32
    return %arg0, %c0_i32 : i32, i32
  }
  func.func @transform_1(%arg0: i32) -> (i32, i32) {
    %c0_i32 = arith.constant 0 : i32
    %c0_i32_0 = arith.constant 0 : i32
    return %arg0, %c0_i32 : i32, i32
  }
}

</mosaic_0001>

<bundles_post_ra>
// kernel: tpu_custom_call.1
= control target key start
LH: loop header
LB: loop body
LE: loop exit
PB: predicated region body
PF: predicated region fallthrough
CT: control target
= control target key end

     0   :  { %6 = vsyncpa [#allocation3], 0  ;;  %s178_s0 = inlined_call_operand.hbm [shape: f32[16,128], index: 0, kind: input, shape index: {}]   ;;  %s179_s1 = inlined_call_operand.hbm [shape: f32[16,128], index: 1, kind: output, shape index: {}]  }
   0x1   :  { %7 = vsyncpa [#allocation4], 0  ;;  %s12_s8 = sshll.u32 %s178_s0, 4  ;;  %s152_s9 = smov [#allocation2]   ;;  %s13_s8 = int_to_ptr.hbm [resolvable:$true] %s12_s8 }
   0x2   :  { %s14_s10 = sshll.u32 %s152_s9, 4  ;;  %s153_s11 = smov 128   ;;  %s15_s10 = int_to_ptr.vmem [resolvable:$true] %s14_s10 }
   0x3   :  { %s154_s12 = smov 8  }
   0x4   :  { %20 = dma.hbm_to_vmem [thread:$0]  %s13_s8, 256, %s15_s10, [#allocation3], %s153_s11, %s153_s11, %s154_s12  }
   0x5   :  { %148 = dma.done.wait [#allocation3], 256  }
   0x6   :  { %149 = vsyncadd [#allocation3], 4294967040  ;;  %v25_v0 = vld [vmem:[#allocation2] sm:$0xff]  ;;  %v26_v1 = vld [vmem:[#allocation2 + $0x8] sm:$0xff]  ;;  %s155_s0 = smov [#allocation5]   ;;  %s75_s16 = sshll.u32 %s179_s1, 4  ;;  %s76_s16 = int_to_ptr.hbm [resolvable:$true] %s75_s16 }
   0x7   :  { %v27_v2 = vsub.f32 0.0, %v25_v0  ;;  %v28_v3 = vsub.f32 0.0, %v26_v1  ;;  %s73_s13 = sshll.u32 %s155_s0, 4  ;;  %s74_s13 = int_to_ptr.vmem [resolvable:$true] %s73_s13 }
   0x9   :  { %v29_v4 = vmul.f32 1.442695, %v27_v2  ;;  %v31_v5 = vmul.f32 1.442695, %v28_v3 }
   0xb   :  { %92 = vpow2.f32 %v29_v4 }
   0xc   :  { %94 = vpow2.f32 %v31_v5 }
  0x11   :  { %v93_v6 = vpop.eup %92 }
  0x12   :  { %v95_v7 = vpop.eup %94  ;;  %v33_v8 = vadd.f32 1.0, %v93_v6 }
  0x13   :  { %v34_v9 = vadd.f32 1.0, %v95_v7 }
  0x14   :  { %96 = vrcp.f32 %v33_v8  ;;  %vm40_vm0 = vweird.f32 %v33_v8  ;;  %v46_v13 = vand.u32 2147483648, %v33_v8  ;;  %v44_v16 = vand.u32 2147483647, %v33_v8 }
  0x15   :  { %98 = vrcp.f32 %v34_v9  ;;  %v61_v17 = vand.u32 2147483648, %v34_v9  ;;  %vm55_vm2 = vweird.f32 %v34_v9  ;;  %v59_v19 = vand.u32 2147483647, %v34_v9 }
  0x16   :  { %v47_v21 = vor.u32 1.1754944e-38, %v46_v13  ;;  %vm45_vm5 = vcmp.eq.f32.partialorder %v44_v16, 8.507059e+37 }
  0x17   :  { %v62_v24 = vor.u32 1.1754944e-38, %v61_v17  ;;  %vm60_vm7 = vcmp.eq.f32.partialorder %v59_v19, 8.507059e+37 }
  0x1a   :  { %v97_v10 = vpop.eup %96 }
  0x1b   :  { %v99_v11 = vpop.eup %98  ;;  %v36_v12 = vmul.f32 %v97_v10, %v33_v8  ;;  %vm41_vm1 = vweird.f32 %v97_v10 }
  0x1c   :  { %v51_v14 = vmul.f32 %v99_v11, %v34_v9  ;;  %vm56_vm3 = vweird.f32 %v99_v11  ;;  %vm42_vm4 = vmor %vm40_vm0, %vm41_vm1 }
  0x1d   :  { %v37_v15 = vsub.f32 1.0, %v36_v12  ;;  %vm57_vm6 = vmor %vm55_vm2, %vm56_vm3 }
  0x1e   :  { %v52_v18 = vsub.f32 1.0, %v51_v14 }
  0x1f   :  { %v38_v20 = vmul.f32 %v97_v10, %v37_v15 }
  0x20   :  { %v53_v22 = vmul.f32 %v99_v11, %v52_v18 }
  0x21   :  { %v39_v23 = vadd.f32 %v97_v10, %v38_v20 }
  0x22   :  { %v54_v25 = vadd.f32 %v99_v11, %v53_v22 }
  0x23   :  { %v43_v26 = vsel %vm42_vm4, %v97_v10, %v39_v23 }
  0x24   :  { %v48_v27 = vsel %vm45_vm5, %v47_v21, %v43_v26  ;;  %v58_v28 = vsel %vm57_vm6, %v99_v11, %v54_v25 }
  0x25   :  { %v65_v29 = vmul.f32 %v48_v27, %v25_v0  ;;  %v63_v30 = vsel %vm60_vm7, %v62_v24, %v58_v28 }
  0x26   :  { %v66_v31 = vmul.f32 %v63_v30, %v26_v1 }
  0x27   :  { %67 = vst [vmem:[#allocation5] sm:$0xff] %v65_v29 }
  0x28   :  { %68 = vst [vmem:[#allocation5 + $0x8] sm:$0xff] %v66_v31 }
  0x29   :  { %81 = dma.vmem_to_hbm [thread:$0]  %s74_s13, 256, %s76_s16, [#allocation4], %s153_s11, %s153_s11, %s154_s12  }
  0x2a   :  { %150 = dma.done.wait [#allocation4], 256  }
  0x2b   :  { %151 = vsyncadd [#allocation4], 4294967040 }
  0x2c   :  { %86 = vsyncpa [#allocation3], 1 }
  0x2d   :  { %87 = vsyncpa [#allocation4], 1 }

</bundles_post_ra>
